<compile_context>
chip_gen: v6e
topology: v6e:2x2x1
jax: 0.10.0
libtpu: 0.0.40
codegen_flags: <defaults>
</compile_context>

<pallas_src>
import functools

import jax
import jax.numpy as jnp
from jax.experimental import pallas as pl
from jax.experimental.pallas import tpu as pltpu


def odenet_kernel(x_ref, w1_ref, b1_ref, w2_ref, b2_ref, o_ref):
    # x_ref : (1, BT)   batch tile on the lane axis
    # w1_ref: (N, BT)   fc1 weight, pre-broadcast along lanes (resident block)
    # b1_ref: (N, BT)   fc1 bias, pre-broadcast
    # w2_ref: (N, BT)   fc2 weight, pre-broadcast
    # b2_ref: (1,)      fc2 bias scalar, in SMEM
    x = x_ref[...]                                       # (1, BT)
    # fc1: pure elementwise VPU work (only x needs a sublane broadcast).
    z = w1_ref[...] * x + b1_ref[...]                    # (N, BT)
    # sigmoid(z) == 0.5 * (tanh(z/2) + 1): single EUP transcendental per vreg.
    h = 0.5 * (jnp.tanh(0.5 * z) + 1.0)                  # (N, BT)
    # fc2: sublane reduction over the hidden axis (XLU), stays off the MXU.
    out = jnp.sum(h * w2_ref[...], axis=0, keepdims=True)  # (1, BT)
    out = out + b2_ref[0]                                # scalar bias from SMEM
    o_ref[...] = out.astype(o_ref.dtype)                 # lane-dense full store


def _round_up(x, m):
    return -(-x // m) * m


@functools.partial(jax.jit, static_argnames=("batch_tile",))
def odenet_forward(x, w1, b1, w2, b2, *, batch_tile=2048):
    """Pallas ODEnet forward.

    x : (B, 1) f32   batch of scalar inputs (PyTorch layout)
    w1: (N, 1) f32   fc1.weight
    b1: (N,)   f32   fc1.bias
    w2: (1, N) f32   fc2.weight
    b2: (1,)   f32   fc2.bias
    returns (B, 1) f32, identical to  sigmoid(x @ w1.T + b1) @ w2.T + b2
    """
    B = x.shape[0]
    N = w1.shape[0]

    # --- choose a lane-aligned batch tile -----------------------------------
    b_lane = _round_up(B, 128)              # lane-aligned batch
    bt = min(batch_tile, b_lane)            # large tiles amortize grid overhead
    if b_lane <= bt and b_lane >= 256:
        # A single giant tile would serialize onto one TensorCore on v7x;
        # split into two parallel tiles instead (still lane-aligned).
        bt = _round_up(b_lane // 2, 128)
    n_tiles = -(-b_lane // bt)
    b_pad = n_tiles * bt

    # --- lane-dense batch layout: batch on lanes ----------------------------
    x_row = x.reshape(1, B).astype(jnp.float32)
    if b_pad != B:
        # Padded samples compute finite garbage that is sliced off below.
        x_row = jnp.pad(x_row, ((0, 0), (0, b_pad - B)))

    # Pre-broadcast weights/bias to full (N, bt) blocks once in the wrapper so
    # the kernel pays no per-grid-step lane-broadcast (constant index_map ->
    # resident in VMEM, DMA'd once per core).
    w1_blk = jnp.broadcast_to(w1.reshape(N, 1).astype(jnp.float32), (N, bt))
    b1_blk = jnp.broadcast_to(b1.reshape(N, 1).astype(jnp.float32), (N, bt))
    w2_blk = jnp.broadcast_to(w2.reshape(N, 1).astype(jnp.float32), (N, bt))
    b2_s = b2.reshape(1,).astype(jnp.float32)

    out_row = pl.pallas_call(
        odenet_kernel,
        out_shape=jax.ShapeDtypeStruct((1, b_pad), jnp.float32),
        grid=(n_tiles,),
        in_specs=[
            # batch tile marches along the lane axis
            pl.BlockSpec((1, bt), lambda i: (0, i)),
            # weights / bias stay resident (constant block index -> one DMA)
            pl.BlockSpec((N, bt), lambda i: (0, 0)),
            pl.BlockSpec((N, bt), lambda i: (0, 0)),
            pl.BlockSpec((N, bt), lambda i: (0, 0)),
            # scalar fc2 bias lives in SMEM
            pl.BlockSpec(memory_space=pltpu.MemorySpace.SMEM),
        ],
        out_specs=pl.BlockSpec((1, bt), lambda i: (0, i)),
        compiler_params=pltpu.CompilerParams(
            dimension_semantics=("parallel",),
        ),
    )(x_row, w1_blk, b1_blk, w2_blk, b2_s)

    return out_row[:, :B].reshape(B, 1)


def init_params(key, N):
    """Deterministic init mimicking nn.Linear (uniform +-1/sqrt(fan_in)).

    The PyTorch __init__ also reads 'W00.txt'/'W01.txt' but never uses them in
    forward(); they are intentionally omitted.
    """
    k1, k2, k3, k4 = jax.random.split(key, 4)
    bound1 = 1.0  # fc1 fan_in = 1
    w1 = jax.random.uniform(k1, (N, 1), jnp.float32, -bound1, bound1)
    b1 = jax.random.uniform(k2, (N,), jnp.float32, -bound1, bound1)
    bound2 = 1.0 / float(N) ** 0.5  # fc2 fan_in = N
    w2 = jax.random.uniform(k3, (1, N), jnp.float32, -bound2, bound2)
    b2 = jax.random.uniform(k4, (1,), jnp.float32, -bound2, bound2)
    return w1, b1, w2, b2


def _reference(x, w1, b1, w2, b2):
    # PyTorch Linear semantics: y = x @ W.T + b
    return jax.nn.sigmoid(x @ w1.T + b1) @ w2.T + b2


if __name__ == "__main__":
    N = 32          # hidden width (the module's `N`)
    B = 8           # batch of scalar inputs

    key = jax.random.PRNGKey(0)
    kx, kp, kx2 = jax.random.split(key, 3)
    w1, b1, w2, b2 = init_params(kp, N)

    # Primary small-shape check (matches the module's scalar-input usage).
    x = jax.random.normal(kx, (B, 1), jnp.float32)
    out = jax.block_until_ready(odenet_forward(x, w1, b1, w2, b2))
    ref = _reference(x, w1, b1, w2, b2)
    assert out.shape == (B, 1)
    assert jnp.allclose(out, ref, atol=1e-5, rtol=1e-5), (
        f"max abs err = {jnp.max(jnp.abs(out - ref))}")

    # Secondary check exercising padding + multi-tile path.
    B2 = 300
    x2 = jax.random.normal(kx2, (B2, 1), jnp.float32)
    out2 = jax.block_until_ready(odenet_forward(x2, w1, b1, w2, b2))
    ref2 = _reference(x2, w1, b1, w2, b2)
    assert out2.shape == (B2, 1)
    assert jnp.allclose(out2, ref2, atol=1e-5, rtol=1e-5), (
        f"max abs err = {jnp.max(jnp.abs(out2 - ref2))}")

    print("KERNEL_OK")
</pallas_src>

<mosaic_0001>
module attributes {stable_mosaic.version = 11 : i64} {
  func.func @odenet_kernel(%arg0: i32, %arg1: memref<1x128xf32, #tpu.memory_space<vmem>>, %arg2: memref<32x128xf32, #tpu.memory_space<vmem>>, %arg3: memref<32x128xf32, #tpu.memory_space<vmem>>, %arg4: memref<32x128xf32, #tpu.memory_space<vmem>>, %arg5: memref<1xf32, #tpu.memory_space<smem>>, %arg6: memref<1x128xf32, #tpu.memory_space<vmem>>) attributes {dimension_semantics = [#tpu.dimension_semantics<parallel>], iteration_bounds = array<i64: 1>, scalar_prefetch = 0 : i64, scratch_operands = 0 : i64, tpu.core_type = #tpu.core_type<tc>, window_params = [{transform_indices = @transform_0, window_bounds = array<i64: 1, 128>}, {pipeline_mode = #tpu.pipeline_mode<synchronous>, transform_indices = @transform_1, window_bounds = array<i64: 32, 128>}, {pipeline_mode = #tpu.pipeline_mode<synchronous>, transform_indices = @transform_2, window_bounds = array<i64: 32, 128>}, {pipeline_mode = #tpu.pipeline_mode<synchronous>, transform_indices = @transform_3, window_bounds = array<i64: 32, 128>}, {transform_indices = @transform_4, window_bounds = array<i64: 1>}, {transform_indices = @transform_5, window_bounds = array<i64: 1, 128>}]} {
    %c0 = arith.constant 0 : index
    %c0_0 = arith.constant 0 : index
    %0 = vector.load %arg1[%c0, %c0_0] : memref<1x128xf32, #tpu.memory_space<vmem>>, vector<1x128xf32>
    %c0_1 = arith.constant 0 : index
    %c0_2 = arith.constant 0 : index
    %1 = vector.load %arg2[%c0_1, %c0_2] : memref<32x128xf32, #tpu.memory_space<vmem>>, vector<32x128xf32>
    %2 = vector.broadcast %0 : vector<1x128xf32> to vector<32x128xf32>
    %3 = arith.mulf %1, %2 : vector<32x128xf32>
    %c0_3 = arith.constant 0 : index
    %c0_4 = arith.constant 0 : index
    %4 = vector.load %arg3[%c0_3, %c0_4] : memref<32x128xf32, #tpu.memory_space<vmem>>, vector<32x128xf32>
    %5 = arith.addf %3, %4 : vector<32x128xf32>
    %cst = arith.constant 5.000000e-01 : f32
    %6 = vector.broadcast %cst : f32 to vector<32x128xf32>
    %7 = arith.mulf %6, %5 : vector<32x128xf32>
    %8 = math.tanh %7 : vector<32x128xf32>
    %cst_5 = arith.constant 1.000000e+00 : f32
    %9 = vector.broadcast %cst_5 : f32 to vector<32x128xf32>
    %10 = arith.addf %8, %9 : vector<32x128xf32>
    %cst_6 = arith.constant 5.000000e-01 : f32
    %11 = vector.broadcast %cst_6 : f32 to vector<32x128xf32>
    %12 = arith.mulf %11, %10 : vector<32x128xf32>
    %c0_7 = arith.constant 0 : index
    %c0_8 = arith.constant 0 : index
    %13 = vector.load %arg4[%c0_7, %c0_8] : memref<32x128xf32, #tpu.memory_space<vmem>>, vector<32x128xf32>
    %14 = arith.mulf %12, %13 : vector<32x128xf32>
    %cst_9 = arith.constant dense<0.000000e+00> : vector<128xf32>
    %15 = vector.multi_reduction <add>, %14, %cst_9 [0] : vector<32x128xf32> to vector<128xf32>
    %16 = vector.shape_cast %15 : vector<128xf32> to vector<1x128xf32>
    %c0_10 = arith.constant 0 : index
    %17 = memref.load %arg5[%c0_10] : memref<1xf32, #tpu.memory_space<smem>>
    %18 = vector.broadcast %17 : f32 to vector<1x128xf32>
    %19 = arith.addf %16, %18 : vector<1x128xf32>
    %c0_11 = arith.constant 0 : index
    %c0_12 = arith.constant 0 : index
    %20 = vector.load %arg6[%c0_11, %c0_12] : memref<1x128xf32, #tpu.memory_space<vmem>>, vector<1x128xf32>
    tpu.vector_store %arg6[%c0_11, %c0_12], %19 {strides = array<i32>} : memref<1x128xf32, #tpu.memory_space<vmem>>, vector<1x128xf32>,
    return
  }
  func.func @transform_0(%arg0: i32) -> (i32, i32) {
    %c0_i32 = arith.constant 0 : i32
    %c0_i32_0 = arith.constant 0 : i32
    return %c0_i32, %arg0 : i32, i32
  }
  func.func @transform_1(%arg0: i32) -> (i32, i32) {
    %c0_i32 = arith.constant 0 : i32
    %c0_i32_0 = arith.constant 0 : i32
    %c0_i32_1 = arith.constant 0 : i32
    return %c0_i32, %c0_i32_0 : i32, i32
  }
  func.func @transform_2(%arg0: i32) -> (i32, i32) {
    %c0_i32 = arith.constant 0 : i32
    %c0_i32_0 = arith.constant 0 : i32
    %c0_i32_1 = arith.constant 0 : i32
    return %c0_i32, %c0_i32_0 : i32, i32
  }
  func.func @transform_3(%arg0: i32) -> (i32, i32) {
    %c0_i32 = arith.constant 0 : i32
    %c0_i32_0 = arith.constant 0 : i32
    %c0_i32_1 = arith.constant 0 : i32
    return %c0_i32, %c0_i32_0 : i32, i32
  }
  func.func @transform_4(%arg0: i32) -> i32 {
    %c0_i32 = arith.constant 0 : i32
    %c0_i32_0 = arith.constant 0 : i32
    return %c0_i32 : i32
  }
  func.func @transform_5(%arg0: i32) -> (i32, i32) {
    %c0_i32 = arith.constant 0 : i32
    %c0_i32_0 = arith.constant 0 : i32
    return %c0_i32, %arg0 : i32, i32
  }
}

</mosaic_0001>

<bundles_post_ra>
// kernel: odenet_forward.1
= control target key start
LH: loop header
LB: loop body
LE: loop exit
PB: predicated region body
PF: predicated region fallthrough
CT: control target
= control target key end

     0   :  { %s169_s0 = inlined_call_operand.vmem [shape: f32[1,128], index: 0, kind: input, shape index: {}]   ;;  %s170_s1 = inlined_call_operand.vmem [shape: f32[32,128], index: 1, kind: input, shape index: {}]   ;;  %s171_s2 = inlined_call_operand.vmem [shape: f32[32,128], index: 2, kind: input, shape index: {}]   ;;  %s172_s3 = inlined_call_operand.vmem [shape: f32[32,128], index: 3, kind: input, shape index: {}]   ;;  %s173_s4 = inlined_call_operand.<no memory space> [shape: f32[1], index: 4, kind: input, shape index: {}]   ;;  %s174_s5 = inlined_call_operand.vmem [shape: f32[1,128], index: 5, kind: output, shape index: {}]  }
   0x1   :  { %v85_v0 = vld [vmem:[%s169_s0] ss:$0 sm:$0xff]  ;;  %v23_v2 = vld [vmem:[%s170_s1 + $0x8] sm:$0xff]  ;;  %v24_v3 = vld [vmem:[%s170_s1 + $0x10] sm:$0xff]  ;;  %v78_v49 = vstv %s173_s4 }
   0x2   :  { %v22_v1 = vld [vmem:[%s170_s1] sm:$0xff]  ;;  %v25_v4 = vld [vmem:[%s170_s1 + $0x18] sm:$0xff]  ;;  %v33_v6 = vmul.f32 %v85_v0, %v23_v2  ;;  %v34_v8 = vmul.f32 %v85_v0, %v24_v3  ;;  %v37_v10 = vld [vmem:[%s171_s2 + $0x8] sm:$0xff] }
   0x3   :  { %v32_v5 = vmul.f32 %v85_v0, %v22_v1  ;;  %v36_v7 = vld [vmem:[%s171_s2] sm:$0xff]  ;;  %v35_v9 = vmul.f32 %v85_v0, %v25_v4  ;;  %v38_v11 = vld [vmem:[%s171_s2 + $0x10] sm:$0xff]  ;;  %v39_v12 = vld [vmem:[%s171_s2 + $0x18] sm:$0xff] }
   0x4   :  { %v41_v14 = vadd.f32 %v37_v10, %v33_v6  ;;  %v42_v15 = vadd.f32 %v38_v11, %v34_v8  ;;  %v60_v26 = vld [vmem:[%s172_s3] sm:$0xff]  ;;  %v61_v30 = vld [vmem:[%s172_s3 + $0x8] sm:$0xff]  ;;  %v62_v33 = vld [vmem:[%s172_s3 + $0x10] sm:$0xff] }
   0x5   :  { %v40_v13 = vadd.f32 %v36_v7, %v32_v5  ;;  %v43_v16 = vadd.f32 %v39_v12, %v35_v9  ;;  %v63_v35 = vld [vmem:[%s172_s3 + $0x18] sm:$0xff] }
   0x6   :  { %v45_v18 = vmul.f32 0.5, %v41_v14  ;;  %v46_v19 = vmul.f32 0.5, %v42_v15 }
   0x7   :  { %v44_v17 = vmul.f32 0.5, %v40_v13  ;;  %v47_v20 = vmul.f32 0.5, %v43_v16 }
   0x9   :  { %86 = vtanh.f32 %v44_v17 }
   0xa   :  { %88 = vtanh.f32 %v45_v18 }
   0xb   :  { %90 = vtanh.f32 %v46_v19 }
   0xc   :  { %92 = vtanh.f32 %v47_v20 }
  0x16   :  { %v87_v21 = vpop.eup %86 }
  0x17   :  { %v89_v22 = vpop.eup %88  ;;  %v52_v23 = vadd.f32 1.0, %v87_v21 }
  0x18   :  { %v91_v24 = vpop.eup %90  ;;  %v53_v25 = vadd.f32 1.0, %v89_v22 }
  0x19   :  { %v93_v27 = vpop.eup %92  ;;  %v54_v28 = vadd.f32 1.0, %v91_v24  ;;  %v56_v29 = vmul.f32 0.5, %v52_v23 }
  0x1a   :  { %v55_v31 = vadd.f32 1.0, %v93_v27  ;;  %v57_v32 = vmul.f32 0.5, %v53_v25 }
  0x1b   :  { %v58_v34 = vmul.f32 0.5, %v54_v28  ;;  %v64_v36 = vmul.f32 %v60_v26, %v56_v29 }
  0x1c   :  { %v59_v37 = vmul.f32 0.5, %v55_v31  ;;  %v65_v38 = vmul.f32 %v61_v30, %v57_v32 }
  0x1d   :  { %v66_v39 = vmul.f32 %v62_v33, %v58_v34 }
  0x1e   :  { %v67_v40 = vmul.f32 %v63_v35, %v59_v37  ;;  %v68_v41 = vadd.f32 %v65_v38, %v64_v36 }
  0x20   :  { %v69_v42 = vadd.f32 %v68_v41, %v66_v39 }
  0x22   :  { %v70_v43 = vadd.f32 %v69_v42, %v67_v40 }
  0x24   :  { %v71_v44 = vrot.slane %v70_v43, 4 }
  0x26   :  { %v72_v45 = vadd.f32 %v71_v44, %v70_v43 }
  0x28   :  { %v73_v46 = vrot.slane %v72_v45, 2 }
  0x2a   :  { %v74_v47 = vadd.f32 %v73_v46, %v72_v45 }
  0x2c   :  { %v75_v48 = vrot.slane %v74_v47, 1 }
  0x2e   :  { %v76_v50 = vadd.f32 %v75_v48, %v74_v47 }
  0x30   :  { %v79_v51 = vadd.f32 %v78_v49, %v76_v50 }
  0x32   :  { %80 = vst [vmem:[%s174_s5] sm:$0x1] %v79_v51 }

</bundles_post_ra>
